<compile_context>
chip_gen: v7x
topology: tpu7x:2x2x1
jax: 0.10.0
libtpu: 0.0.40
codegen_flags: <defaults>
</compile_context>

<pallas_src>
import functools

import jax
import jax.numpy as jnp
from jax.experimental import pallas as pl
from jax.experimental.pallas import tpu as pltpu

_LANE = 128
_MAX_TILE = 512
_VMEM_LIMIT = 48 * 1024 * 1024  # explicit scoped-VMEM cap; < 64 MiB (v7x per-TC)


def _round_up(n, m):
    return ((n + m - 1) // m) * m


def _pick_tile(n):
    # Tile that is a multiple of 128 lanes / sublane-friendly, capped at 512.
    return min(_MAX_TILE, _round_up(max(n, 1), _LANE))


def _pad2(a, rows, cols):
    r, c = a.shape
    if r == rows and c == cols:
        return a
    return jnp.pad(a, ((0, rows - r), (0, cols - c)))


def _matmul_bias_kernel(a_ref, b_ref, bias_ref, o_ref, acc_ref):
    """out = a @ b + bias; bf16 operands on the MXU, f32 accumulation."""
    k = pl.program_id(2)

    @pl.when(k == 0)
    def _():
        acc_ref[...] = jnp.zeros_like(acc_ref)

    acc_ref[...] += jnp.dot(a_ref[...], b_ref[...],
                            preferred_element_type=jnp.float32)

    @pl.when(k == pl.num_programs(2) - 1)
    def _():
        o_ref[...] = (acc_ref[...] + bias_ref[...]).astype(o_ref.dtype)


def matmul_bias_pallas(a, b, bias=None):
    """f32 result of (a @ b) + bias via a tiled Pallas MXU kernel (bf16 inputs)."""
    M, Kd = a.shape
    Kd2, N = b.shape
    assert Kd == Kd2

    tm, tk, tn = _pick_tile(M), _pick_tile(Kd), _pick_tile(N)
    Mp, Kp, Np = _round_up(M, tm), _round_up(Kd, tk), _round_up(N, tn)

    a_p = _pad2(a.astype(jnp.float32), Mp, Kp).astype(jnp.bfloat16)
    b_p = _pad2(b.astype(jnp.float32), Kp, Np).astype(jnp.bfloat16)
    if bias is None:
        bias_p = jnp.zeros((1, Np), jnp.float32)
    else:
        bias_p = _pad2(bias.reshape(1, -1).astype(jnp.float32), 1, Np)

    out = pl.pallas_call(
        _matmul_bias_kernel,
        out_shape=jax.ShapeDtypeStruct((Mp, Np), jnp.float32),
        grid_spec=pltpu.PrefetchScalarGridSpec(
            num_scalar_prefetch=0,
            grid=(Mp // tm, Np // tn, Kp // tk),
            in_specs=[
                pl.BlockSpec((tm, tk), lambda i, j, k: (i, k)),
                pl.BlockSpec((tk, tn), lambda i, j, k: (k, j)),
                pl.BlockSpec((1, tn), lambda i, j, k: (0, j)),
            ],
            out_specs=pl.BlockSpec((tm, tn), lambda i, j, k: (i, j)),
            scratch_shapes=[pltpu.VMEM((tm, tn), jnp.float32)],
        ),
        compiler_params=pltpu.CompilerParams(
            dimension_semantics=("parallel", "parallel", "arbitrary"),
            vmem_limit_bytes=_VMEM_LIMIT,
        ),
    )(a_p, b_p, bias_p)
    return out[:M, :N]


def _build_norm_adjacency(edge_index, edge_weights, num_nodes):
    """Plain-JAX glue: elu-clamp of edge weights + gcn_norm, densified."""
    N = num_nodes
    # edge_weights.data[F.elu(w) <= 0] = 1e-07
    ew = jnp.where(edge_weights <= 0.0, jnp.float32(1e-7),
                   edge_weights.astype(jnp.float32))

    row, col = edge_index[0], edge_index[1]
    # add_remaining_self_loops with fill value 1.0
    # NOTE: assumes the incoming edge_index has no pre-existing self loops.
    loop_idx = jnp.arange(N, dtype=edge_index.dtype)
    row = jnp.concatenate([row, loop_idx])
    col = jnp.concatenate([col, loop_idx])
    ew = jnp.concatenate([ew, jnp.ones((N,), jnp.float32)])

    # gcn_norm: degree at target index (col), then D^-1/2 A D^-1/2.
    deg = jnp.zeros((N,), jnp.float32).at[col].add(ew)
    dinv = jnp.where(deg > 0.0, jax.lax.rsqrt(deg), 0.0)
    norm = dinv[row] * ew * dinv[col]

    # Dense normalized adjacency acting as out[i] = sum_j A[i, j] * x[j].
    # TODO(synk): for large truly-sparse graphs replace with a gather-based SpMM.
    return jnp.zeros((N, N), jnp.float32).at[col, row].add(norm)


@functools.partial(jax.jit, static_argnames="K")
def simple_gcn_net_forward(x, edge_index, edge_weights, lin_w, lin_b, K):
    """JAX equivalent of SimpleGCNNet.forward (matmul hot path in Pallas)."""
    N, T = x.shape
    H = lin_w.shape[0]
    a_norm = _build_norm_adjacency(edge_index, edge_weights, N)

    x = x.astype(jnp.float32)
    wt = lin_w.T.astype(jnp.float32)  # (T, H)

    if H < T and K > 0:
        # Project first, then propagate on the narrower H lanes (associativity).
        h = matmul_bias_pallas(x, wt)                       # (N, H)
        for k in range(K):
            h = matmul_bias_pallas(a_norm, h,
                                   lin_b if k == K - 1 else None)
        return h

    # Propagate first (H >= T), then project.
    h = x
    for _ in range(K):
        h = matmul_bias_pallas(a_norm, h)                   # (N, T)
    return matmul_bias_pallas(h, wt, lin_b)                 # (N, H)


if __name__ == "__main__":
    # Small deterministic problem: N nodes, T time_steps, H hiddens, K hops.
    N, T, H, K = 16, 16, 32, 2

    key = jax.random.PRNGKey(0)
    k_x, k_ew, k_w, k_b = jax.random.split(key, 4)

    # node features: [N, T]
    x = jax.random.normal(k_x, (N, T), dtype=jnp.float32)

    # bidirectional ring graph (no self loops), E = 2N edges
    src = jnp.concatenate([jnp.arange(N), jnp.arange(N)]).astype(jnp.int32)
    dst = jnp.concatenate([(jnp.arange(N) + 1) % N,
                           (jnp.arange(N) - 1) % N]).astype(jnp.int32)
    edge_index = jnp.stack([src, dst], axis=0)          # [2, E]

    # learnable edge weights (Parameter in the torch module)
    edge_weights = jax.random.normal(k_ew, (edge_index.shape[1],),
                                     dtype=jnp.float32)

    # SGConv's Linear(time_steps, num_hiddens) params; torch layout [out, in]
    lin_w = 0.1 * jax.random.normal(k_w, (H, T), dtype=jnp.float32)
    lin_b = 0.1 * jax.random.normal(k_b, (H,), dtype=jnp.float32)

    out = simple_gcn_net_forward(x, edge_index, edge_weights, lin_w, lin_b, K)
    out = jax.block_until_ready(out)
    assert out.shape == (N, H) and out.dtype == jnp.float32

    # Loose sanity check vs. a plain-JAX reference with the same bf16/f32 mix.
    a_norm = _build_norm_adjacency(edge_index, edge_weights, N)
    ref = x.astype(jnp.float32)
    for _ in range(K):
        ref = jnp.dot(a_norm.astype(jnp.bfloat16), ref.astype(jnp.bfloat16),
                      preferred_element_type=jnp.float32)
    ref = jnp.dot(ref.astype(jnp.bfloat16), lin_w.T.astype(jnp.bfloat16),
                  preferred_element_type=jnp.float32) + lin_b[None, :]
    assert jnp.allclose(out, ref, rtol=5e-2, atol=5e-2), \
        float(jnp.max(jnp.abs(out - ref)))

    print("KERNEL_OK")
</pallas_src>

<mosaic_0001>
module attributes {stable_mosaic.version = 11 : i64} {
  func.func private @main(%arg0: i32) attributes {dimension_semantics = [#tpu.dimension_semantics<core_parallel>], iteration_bounds = array<i64: 2>, tpu.core_type = #tpu.core_type<sc_scalar_subcore>, window_params = []} {
    return
  }
}

module attributes {stable_mosaic.version = 11 : i64} {
  func.func private @main(%arg0: i32) attributes {dimension_semantics = [#tpu.dimension_semantics<core_parallel>], iteration_bounds = array<i64: 2>, tpu.core_type = #tpu.core_type<sc_scalar_subcore>, window_params = []} {
    return
  }
}

module attributes {stable_mosaic.version = 11 : i64} {
  func.func @_matmul_bias_kernel(%arg0: i32, %arg1: i32, %arg2: i32, %arg3: memref<128x128xbf16, #tpu.memory_space<vmem>>, %arg4: memref<128x128xbf16, #tpu.memory_space<vmem>>, %arg5: memref<1x128xf32, #tpu.memory_space<vmem>>, %arg6: memref<128x128xf32, #tpu.memory_space<vmem>>, %arg7: memref<128x128xf32, #tpu.memory_space<vmem>>) attributes {dimension_semantics = [#tpu.dimension_semantics<parallel>, #tpu.dimension_semantics<parallel>, #tpu.dimension_semantics<arbitrary>], iteration_bounds = array<i64: 1, 1, 1>, scalar_prefetch = 0 : i64, scratch_operands = 1 : i64, tpu.core_type = #tpu.core_type<tc>, window_params = [{transform_indices = @transform_0, window_bounds = array<i64: 128, 128>}, {transform_indices = @transform_1, window_bounds = array<i64: 128, 128>}, {transform_indices = @transform_2, window_bounds = array<i64: 1, 128>}, {transform_indices = @transform_3, window_bounds = array<i64: 128, 128>}]} {
    %c0_i32 = arith.constant 0 : i32
    %0 = arith.cmpi eq, %arg2, %c0_i32 : i32
    %1 = arith.extui %0 : i1 to i32
    %c0_i32_0 = arith.constant 0 : i32
    %2 = arith.cmpi ne, %1, %c0_i32_0 : i32
    scf.if %2 {
      %cst_10 = arith.constant 0.000000e+00 : f32
      %12 = vector.broadcast %cst_10 : f32 to vector<128x128xf32>
      %c0_11 = arith.constant 0 : index
      %c0_12 = arith.constant 0 : index
      %13 = vector.load %arg7[%c0_11, %c0_12] : memref<128x128xf32, #tpu.memory_space<vmem>>, vector<128x128xf32>
      tpu.vector_store %arg7[%c0_11, %c0_12], %12 {strides = array<i32>} : memref<128x128xf32, #tpu.memory_space<vmem>>, vector<128x128xf32>,
    } else {
    }
    %c0 = arith.constant 0 : index
    %c0_1 = arith.constant 0 : index
    %3 = vector.load %arg7[%c0, %c0_1] : memref<128x128xf32, #tpu.memory_space<vmem>>, vector<128x128xf32>
    %c0_2 = arith.constant 0 : index
    %c0_3 = arith.constant 0 : index
    %4 = vector.load %arg3[%c0_2, %c0_3] : memref<128x128xbf16, #tpu.memory_space<vmem>>, vector<128x128xbf16>
    %c0_4 = arith.constant 0 : index
    %c0_5 = arith.constant 0 : index
    %5 = vector.load %arg4[%c0_4, %c0_5] : memref<128x128xbf16, #tpu.memory_space<vmem>>, vector<128x128xbf16>
    %cst = arith.constant dense<0.000000e+00> : vector<128x128xf32>
    %6 = tpu.matmul %4, %5, %cst {dimension_numbers = #tpu.dot_dimension_numbers<[1], [0], [0], [1], [0, 0, 1, 1], [], []>} : vector<128x128xbf16>, vector<128x128xbf16>, vector<128x128xf32> -> vector<128x128xf32>
    %7 = arith.addf %3, %6 : vector<128x128xf32>
    %c0_6 = arith.constant 0 : index
    %c0_7 = arith.constant 0 : index
    %8 = vector.load %arg7[%c0_6, %c0_7] : memref<128x128xf32, #tpu.memory_space<vmem>>, vector<128x128xf32>
    tpu.vector_store %arg7[%c0_6, %c0_7], %7 {strides = array<i32>} : memref<128x128xf32, #tpu.memory_space<vmem>>, vector<128x128xf32>,
    %c0_i32_8 = arith.constant 0 : i32
    %9 = arith.cmpi eq, %arg2, %c0_i32_8 : i32
    %10 = arith.extui %9 : i1 to i32
    %c0_i32_9 = arith.constant 0 : i32
    %11 = arith.cmpi ne, %10, %c0_i32_9 : i32
    scf.if %11 {
      %c0_10 = arith.constant 0 : index
      %c0_11 = arith.constant 0 : index
      %12 = vector.load %arg7[%c0_10, %c0_11] : memref<128x128xf32, #tpu.memory_space<vmem>>, vector<128x128xf32>
      %c0_12 = arith.constant 0 : index
      %c0_13 = arith.constant 0 : index
      %13 = vector.load %arg5[%c0_12, %c0_13] : memref<1x128xf32, #tpu.memory_space<vmem>>, vector<1x128xf32>
      %14 = vector.broadcast %13 : vector<1x128xf32> to vector<128x128xf32>
      %15 = arith.addf %12, %14 : vector<128x128xf32>
      %c0_14 = arith.constant 0 : index
      %c0_15 = arith.constant 0 : index
      %16 = vector.load %arg6[%c0_14, %c0_15] : memref<128x128xf32, #tpu.memory_space<vmem>>, vector<128x128xf32>
      tpu.vector_store %arg6[%c0_14, %c0_15], %15 {strides = array<i32>} : memref<128x128xf32, #tpu.memory_space<vmem>>, vector<128x128xf32>,
    } else {
    }
    return
  }
  func.func @transform_0(%arg0: i32, %arg1: i32, %arg2: i32) -> (i32, i32) {
    %c0_i32 = arith.constant 0 : i32
    return %arg0, %arg2 : i32, i32
  }
  func.func @transform_1(%arg0: i32, %arg1: i32, %arg2: i32) -> (i32, i32) {
    %c0_i32 = arith.constant 0 : i32
    return %arg2, %arg1 : i32, i32
  }
  func.func @transform_2(%arg0: i32, %arg1: i32, %arg2: i32) -> (i32, i32) {
    %c0_i32 = arith.constant 0 : i32
    %c0_i32_0 = arith.constant 0 : i32
    return %c0_i32, %arg1 : i32, i32
  }
  func.func @transform_3(%arg0: i32, %arg1: i32, %arg2: i32) -> (i32, i32) {
    %c0_i32 = arith.constant 0 : i32
    return %arg0, %arg1 : i32, i32
  }
}

</mosaic_0001>

<bundles_post_ra>
// kernel: simple_gcn_net_forward.3
= control target key start
LH: loop header
LB: loop body
LE: loop exit
PB: predicated region body
PF: predicated region fallthrough
CT: control target
= control target key end

     0   :  { %s586_s1 = inlined_call_operand.vmem [shape: bf16[128,128], index: 1, kind: input, shape index: {}]   ;;  %s587_s0 = inlined_call_operand.vmem [shape: bf16[128,128], index: 0, kind: input, shape index: {}]   ;;  %s588_s2 = inlined_call_operand.vmem [shape: f32[1,128], index: 2, kind: input, shape index: {}]   ;;  %s589_s3 = inlined_call_operand.vmem [shape: f32[128,128], index: 3, kind: output, shape index: {}]  }
   0x1   :  { %v451_v0 = vld [vmem:[%s586_s1] sm:$0xff]   ;;  %v452_v1 = vld [vmem:[%s586_s1 + $0x8] sm:$0xff]   ;;  %v453_v2 = vld [vmem:[%s586_s1 + $0x10] sm:$0xff]  }
   0x2   :  { %403 = vmatprep.subr.bf16.mxu0 %v451_v0  ;;  %435 = vmatprep.subr.bf16.mxu1 %v451_v0  ;;  %v454_v3 = vld [vmem:[%s586_s1 + $0x18] sm:$0xff]   ;;  %v459_v4 = vld [vmem:[%s587_s0] sm:$0xff]   ;;  %v456_v7 = vld [vmem:[%s586_s1 + $0x28] sm:$0xff]  }
   0x3   :  { %404 = vmatpush3.bf16.msra.mxu0 %v451_v0  ;;  %443 = vmatpush3.bf16.msra.mxu1 %v451_v0  ;;  %v460_v5 = vld [vmem:[%s587_s0 + $0x20] sm:$0xff]   ;;  %v457_v8 = vld [vmem:[%s586_s1 + $0x30] sm:$0xff]   ;;  %v458_v9 = vld [vmem:[%s586_s1 + $0x38] sm:$0xff]  }
   0x4   :  { %405 = vmatprep.subr.bf16.mxu0 %v452_v1  ;;  %436 = vmatprep.subr.bf16.mxu1 %v452_v1  ;;  %v455_v6 = vld [vmem:[%s586_s1 + $0x20] sm:$0xff]   ;;  %v461_v10 = vld [vmem:[%s587_s0 + $0x8] sm:$0xff]   ;;  %v463_v12 = vld [vmem:[%s587_s0 + $0x10] sm:$0xff]  }
   0x5   :  { %419 = vmatprep.mubr.bf16.mxu0 %v459_v4  ;;  %427 = vmatprep.mubr.bf16.mxu1 %v460_v5  ;;  %v462_v11 = vld [vmem:[%s587_s0 + $0x28] sm:$0xff]   ;;  %v464_v13 = vld [vmem:[%s587_s0 + $0x30] sm:$0xff]   ;;  %v465_v14 = vld [vmem:[%s587_s0 + $0x18] sm:$0xff]  }
   0x6   :  { %v466_v15 = vld [vmem:[%s587_s0 + $0x38] sm:$0xff]   ;;  %v386_v16 = vld [vmem:[%s588_s2] ss:$0 sm:$0xff] }
   0x7   :  { %406 = vmatpush3.bf16.msra.mxu0 %v452_v1  ;;  %444 = vmatpush3.bf16.msra.mxu1 %v452_v1 }
   0x8   :  { %407 = vmatprep.subr.bf16.mxu0 %v453_v2  ;;  %437 = vmatprep.subr.bf16.mxu1 %v453_v2 }
   0xb   :  { %408 = vmatpush3.bf16.msra.mxu0 %v453_v2  ;;  %445 = vmatpush3.bf16.msra.mxu1 %v453_v2 }
   0xc   :  { %409 = vmatprep.subr.bf16.mxu0 %v454_v3  ;;  %438 = vmatprep.subr.bf16.mxu1 %v454_v3 }
   0xf   :  { %410 = vmatpush3.bf16.msra.mxu0 %v454_v3  ;;  %446 = vmatpush3.bf16.msra.mxu1 %v454_v3 }
  0x10   :  { %411 = vmatprep.subr.bf16.mxu0 %v455_v6  ;;  %439 = vmatprep.subr.bf16.mxu1 %v455_v6 }
  0x13   :  { %412 = vmatpush3.bf16.msra.mxu0 %v455_v6  ;;  %447 = vmatpush3.bf16.msra.mxu1 %v455_v6 }
  0x14   :  { %413 = vmatprep.subr.bf16.mxu0 %v456_v7  ;;  %440 = vmatprep.subr.bf16.mxu1 %v456_v7 }
  0x17   :  { %414 = vmatpush3.bf16.msra.mxu0 %v456_v7  ;;  %448 = vmatpush3.bf16.msra.mxu1 %v456_v7 }
  0x18   :  { %415 = vmatprep.subr.bf16.mxu0 %v457_v8  ;;  %441 = vmatprep.subr.bf16.mxu1 %v457_v8 }
  0x1b   :  { %416 = vmatpush3.bf16.msra.mxu0 %v457_v8  ;;  %449 = vmatpush3.bf16.msra.mxu1 %v457_v8 }
  0x1c   :  { %417 = vmatprep.subr.bf16.mxu0 %v458_v9  ;;  %442 = vmatprep.subr.bf16.mxu1 %v458_v9 }
  0x1f   :  { %418 = vmatpush3.bf16.msra.mxu0 %v458_v9  ;;  %450 = vmatpush3.bf16.msra.mxu1 %v458_v9 }
  0x22   :  { %420 = vmatmul.mubr.bf16.vlgmr.msra.gmra.mrb[0].mxu0 %v461_v10  ;;  %428 = vmatmul.mubr.bf16.vlgmr.msra.gmra.mrb[0].mxu1 %v462_v11 }
  0x23   :  { %423 = vmatprep.mubr.bf16.mxu0 %v463_v12  ;;  %431 = vmatprep.mubr.bf16.mxu1 %v464_v13 }
  0x2a   :  { %424 = vmatmul.mubr.bf16.gmra.mrb[4].mxu0 %v465_v14  ;;  %432 = vmatmul.mubr.bf16.gmra.mrb[4].mxu1 %v466_v15 }
  0xf5   :  { %v421_v17 = vpop.f32.mrb[0].mxu0  ;;  %v429_v18 = vpop.f32.mrb[0].mxu1 }
  0xf6   :  { %v336_v19 = vadd.f32 %v421_v17, %v386_v16  ;;  %v344_v20 = vadd.f32 %v429_v18, %v386_v16  ;;  %v213_v21 = vpop.f32.mrb[1].mxu0  ;;  %v245_v22 = vpop.f32.mrb[1].mxu1 }
  0xf7   :  { %v334_v23 = vadd.f32 %v386_v16, %v213_v21  ;;  %v342_v24 = vadd.f32 %v386_v16, %v245_v22  ;;  %v422_v25 = vpop.f32.mrb[2].mxu0  ;;  %v430_v26 = vpop.f32.mrb[2].mxu1 }
  0xf8   :  { %352 = vst [vmem:[%s589_s3 + $0x10] sm:$0xff] %v336_v19  ;;  %360 = vst [vmem:[%s589_s3 + $0x50] sm:$0xff] %v344_v20  ;;  %v337_v27 = vadd.f32 %v422_v25, %v386_v16  ;;  %v345_v28 = vadd.f32 %v430_v26, %v386_v16  ;;  %v216_v29 = vpop.f32.mrb[3].mxu0  ;;  %v248_v30 = vpop.f32.mrb[3].mxu1 }
  0xf9   :  { %350 = vst [vmem:[%s589_s3] sm:$0xff] %v334_v23  ;;  %358 = vst [vmem:[%s589_s3 + $0x40] sm:$0xff] %v342_v24  ;;  %v335_v31 = vadd.f32 %v386_v16, %v216_v29  ;;  %v343_v32 = vadd.f32 %v386_v16, %v248_v30 }
  0xfa   :  { %353 = vst [vmem:[%s589_s3 + $0x18] sm:$0xff] %v337_v27  ;;  %361 = vst [vmem:[%s589_s3 + $0x58] sm:$0xff] %v345_v28 }
  0xfb   :  { %351 = vst [vmem:[%s589_s3 + $0x8] sm:$0xff] %v335_v31  ;;  %359 = vst [vmem:[%s589_s3 + $0x48] sm:$0xff] %v343_v32 }
  0xfd   :  { %v425_v33 = vpop.f32.mrb[4].mxu0  ;;  %v433_v34 = vpop.f32.mrb[4].mxu1 }
  0xfe   :  { %v340_v35 = vadd.f32 %v425_v33, %v386_v16  ;;  %v348_v36 = vadd.f32 %v433_v34, %v386_v16  ;;  %v229_v37 = vpop.f32.mrb[5].mxu0  ;;  %v261_v38 = vpop.f32.mrb[5].mxu1 }
  0xff   :  { %v338_v39 = vadd.f32 %v386_v16, %v229_v37  ;;  %v346_v40 = vadd.f32 %v386_v16, %v261_v38  ;;  %v426_v41 = vpop.f32.mrb[6].mxu0  ;;  %v434_v42 = vpop.f32.mrb[6].mxu1 }
 0x100   :  { %356 = vst [vmem:[%s589_s3 + $0x30] sm:$0xff] %v340_v35  ;;  %364 = vst [vmem:[%s589_s3 + $0x70] sm:$0xff] %v348_v36  ;;  %v341_v43 = vadd.f32 %v426_v41, %v386_v16  ;;  %v349_v44 = vadd.f32 %v434_v42, %v386_v16  ;;  %v232_v45 = vpop.f32.mrb[7].mxu0  ;;  %v264_v46 = vpop.f32.mrb[7].mxu1 }
 0x101   :  { %354 = vst [vmem:[%s589_s3 + $0x20] sm:$0xff] %v338_v39  ;;  %362 = vst [vmem:[%s589_s3 + $0x60] sm:$0xff] %v346_v40  ;;  %v339_v47 = vadd.f32 %v386_v16, %v232_v45  ;;  %v347_v48 = vadd.f32 %v386_v16, %v264_v46 }
 0x102   :  { %357 = vst [vmem:[%s589_s3 + $0x38] sm:$0xff] %v341_v43  ;;  %365 = vst [vmem:[%s589_s3 + $0x78] sm:$0xff] %v349_v44 }
 0x103   :  { %355 = vst [vmem:[%s589_s3 + $0x28] sm:$0xff] %v339_v47  ;;  %363 = vst [vmem:[%s589_s3 + $0x68] sm:$0xff] %v347_v48 }

</bundles_post_ra>
